<compile_context>
chip_gen: v6e
topology: v6e:2x2x1
jax: 0.10.0
libtpu: 0.0.40
codegen_flags: <defaults>
</compile_context>

<pallas_src>
import math
from functools import partial

import jax
import jax.numpy as jnp
from jax.experimental import pallas as pl
from jax.experimental.pallas import tpu as pltpu

LANE = 128
SUBLANE = 8


# ----------------------------------------------------------------------------
# helpers
# ----------------------------------------------------------------------------
def _round_up(x, m):
    return (x + m - 1) // m * m


def _const_spec(shape):
    """Whole-array block whose index does not change across the 1-D grid."""
    n = len(shape)
    return pl.BlockSpec(shape, lambda s, _n=n: (0,) * _n)


def _linear_init(key, fan_in, fan_out):
    # PyTorch nn.Linear default: U(-1/sqrt(fan_in), 1/sqrt(fan_in))
    kw, kb = jax.random.split(key)
    bound = 1.0 / math.sqrt(fan_in)
    w = jax.random.uniform(kw, (fan_in, fan_out), jnp.float32, -bound, bound)
    b = jax.random.uniform(kb, (1, fan_out), jnp.float32, -bound, bound)
    return w, b


# ----------------------------------------------------------------------------
# fused kernel
#   grid axis 0: spatial tiles of the image (GAP reduction, "arbitrary")
#   step 0    : zero pooled accumulator
#   all steps : accumulate partial spatial sums
#   last step : image Linear, meta split-matmul + ReLU, both InterCEResModules,
#               head Linear (split over [img | meta] features), packed store.
# ----------------------------------------------------------------------------
def _fused_isic_kernel(
    img_ref, mnum_ref, mcat_ref,
    w_img_ref, b_img_ref,
    w_mn_ref, w_mc_ref, b_meta_ref,
    w1i_ref, b1i_ref, w2i_ref, b2i_ref,
    w1m_ref, b1m_ref, w2m_ref, b2m_ref,
    whi_ref, whm_ref, bh_ref,
    out_ref,
    pooled_acc,
    *, inv_hw, num_classes,
):
    s = pl.program_id(0)

    @pl.when(s == 0)
    def _():
        pooled_acc[...] = jnp.zeros_like(pooled_acc)

    # GAP partial sum over this spatial tile (zero-padded positions are inert).
    pooled_acc[...] += jnp.sum(img_ref[...].astype(jnp.float32), axis=-1)

    @pl.when(s == pl.num_programs(0) - 1)
    def _():
        f32 = jnp.float32
        pooled = pooled_acc[...] * inv_hw                                   # (B, C)

        # synthetic image backbone head: Linear -> (B, F_img)
        imgf = (
            jnp.dot(pooled, w_img_ref[...], preferred_element_type=f32)
            + b_img_ref[...]
        )

        # synthetic meta backbone: split matmul [numeric | one-hot cat] + ReLU
        metaf = (
            jnp.dot(mnum_ref[...], w_mn_ref[...], preferred_element_type=f32)
            + jnp.dot(mcat_ref[...], w_mc_ref[...], preferred_element_type=f32)
            + b_meta_ref[...]
        )
        metaf = jnp.maximum(metaf, 0.0)

        def masked_softmax(x):
            # class dim is zero-padded to 128 lanes; mask padded lanes out.
            lane = jax.lax.broadcasted_iota(jnp.int32, x.shape, 1)
            xm = jnp.where(lane < num_classes, x, -1e30)
            m = jnp.max(xm, axis=-1, keepdims=True)
            e = jnp.exp(xm - m)
            return e * pl.reciprocal(jnp.sum(e, axis=-1, keepdims=True), approx=True)

        # InterCEResModule (image branch)
        li = jnp.dot(imgf, w1i_ref[...], preferred_element_type=f32) + b1i_ref[...]
        imgf = (
            imgf
            + jnp.dot(masked_softmax(li), w2i_ref[...], preferred_element_type=f32)
            + b2i_ref[...]
        )

        # InterCEResModule (meta branch)
        lm = jnp.dot(metaf, w1m_ref[...], preferred_element_type=f32) + b1m_ref[...]
        metaf = (
            metaf
            + jnp.dot(masked_softmax(lm), w2m_ref[...], preferred_element_type=f32)
            + b2m_ref[...]
        )

        # head: Identity (use_bn=False) -> Dropout(eval)=Identity -> Linear(concat)
        # computed as a split matmul (exactly equivalent to concat @ W_head)
        out = (
            jnp.dot(imgf, whi_ref[...], preferred_element_type=f32)
            + jnp.dot(metaf, whm_ref[...], preferred_element_type=f32)
            + bh_ref[...]
        )

        # lane-dense packed store: [output, image_logits, meta_logits]
        out_ref[0] = out
        out_ref[1] = li
        out_ref[2] = lm


# ----------------------------------------------------------------------------
# parameter prep (done once, outside jit): pad class dims to 128 lanes and
# split the meta weight into numeric / categorical halves.
# ----------------------------------------------------------------------------
def prepare_kernel_params(params, n_num, num_classes):
    nc_pad = _round_up(num_classes, LANE)

    def pad_cols(w):  # (*, num_classes) -> (*, nc_pad), zero padded
        return jnp.pad(w, ((0, 0), (0, nc_pad - w.shape[1])))

    def pad_rows(w):  # (num_classes, *) -> (nc_pad, *), zero padded
        return jnp.pad(w, ((0, nc_pad - w.shape[0]), (0, 0)))

    return dict(
        w_img=params["w_img"], b_img=params["b_img"],
        w_mn=params["w_meta"][:n_num], w_mc=params["w_meta"][n_num:],
        b_meta=params["b_meta"],
        w1i=pad_cols(params["w1i"]), b1i=pad_cols(params["b1i"]),
        w2i=pad_rows(params["w2i"]), b2i=params["b2i"],
        w1m=pad_cols(params["w1m"]), b1m=pad_cols(params["b1m"]),
        w2m=pad_rows(params["w2m"]), b2m=params["b2m"],
        whi=pad_cols(params["whi"]), whm=pad_cols(params["whm"]),
        bh=pad_cols(params["bh"]),
    )


_WEIGHT_ORDER = (
    "w_img", "b_img", "w_mn", "w_mc", "b_meta",
    "w1i", "b1i", "w2i", "b2i",
    "w1m", "b1m", "w2m", "b2m",
    "whi", "whm", "bh",
)


# ----------------------------------------------------------------------------
# full model wrapper (single fused pallas_call)
# ----------------------------------------------------------------------------
@partial(jax.jit, static_argnames=("num_classes",))
def isic_model_forward(image, metadata_num, metadata_cat_onehot, kparams, num_classes):
    B, C, H, W = image.shape
    HW = H * W
    B_pad = _round_up(B, SUBLANE)
    nc_pad = _round_up(num_classes, LANE)

    # spatial tile: multiple of 128 lanes, sized from a per-buffer byte budget
    # so the (double-buffered) image block stays well inside scoped VMEM on
    # every TPU generation while staying as large as possible (fewer, bigger
    # DMAs ~ better HBM roofline fraction).
    per_buf_budget = 4 * 1024 * 1024                                  # bytes
    tile_cap = max(LANE, (per_buf_budget // (B_pad * C * 4)) // LANE * LANE)
    s_tile = min(_round_up(HW, LANE), tile_cap)
    hw_pad = _round_up(HW, s_tile)

    img = image.reshape(B, C, HW)
    img = jnp.pad(img, ((0, B_pad - B), (0, 0), (0, hw_pad - HW)))
    mnum = jnp.pad(metadata_num, ((0, B_pad - B), (0, 0)))
    mcat = jnp.pad(metadata_cat_onehot, ((0, B_pad - B), (0, 0)))

    weights = tuple(kparams[k] for k in _WEIGHT_ORDER)

    kernel = partial(_fused_isic_kernel, inv_hw=1.0 / HW, num_classes=num_classes)

    packed = pl.pallas_call(
        kernel,
        out_shape=jax.ShapeDtypeStruct((3, B_pad, nc_pad), jnp.float32),
        grid_spec=pltpu.PrefetchScalarGridSpec(
            num_scalar_prefetch=0,
            grid=(hw_pad // s_tile,),
            in_specs=(
                [pl.BlockSpec((B_pad, C, s_tile), lambda s: (0, 0, s))]
                + [_const_spec(mnum.shape), _const_spec(mcat.shape)]
                + [_const_spec(w.shape) for w in weights]
            ),
            out_specs=pl.BlockSpec((3, B_pad, nc_pad), lambda s: (0, 0, 0)),
            scratch_shapes=[pltpu.VMEM((B_pad, C), jnp.float32)],
        ),
        compiler_params=pltpu.CompilerParams(
            dimension_semantics=("arbitrary",),       # GAP reduction axis
            vmem_limit_bytes=32 * 1024 * 1024,        # explicit, safe on v5e/v6e/v7x
        ),
    )(img, mnum, mcat, *weights)

    output = packed[0, :B, :num_classes]
    img_logits = packed[1, :B, :num_classes]
    meta_logits = packed[2, :B, :num_classes]
    return output, img_logits, meta_logits


# ----------------------------------------------------------------------------
# pure-JAX reference for correctness checking (original, unpadded params)
# ----------------------------------------------------------------------------
def reference_forward(image, metadata_num, metadata_cat_onehot, params):
    B, C, H, W = image.shape
    pooled = jnp.mean(image.reshape(B, C, H * W), axis=-1)
    img_feat = pooled @ params["w_img"] + params["b_img"]
    meta_x = jnp.concatenate([metadata_num, metadata_cat_onehot], axis=-1)
    meta_feat = jnp.maximum(meta_x @ params["w_meta"] + params["b_meta"], 0.0)

    li = img_feat @ params["w1i"] + params["b1i"]
    img_feat = img_feat + jax.nn.softmax(li, axis=-1) @ params["w2i"] + params["b2i"]
    lm = meta_feat @ params["w1m"] + params["b1m"]
    meta_feat = meta_feat + jax.nn.softmax(lm, axis=-1) @ params["w2m"] + params["b2m"]

    feats = jnp.concatenate([img_feat, meta_feat], axis=-1)
    w_head = jnp.concatenate([params["whi"], params["whm"]], axis=0)
    out = feats @ w_head + params["bh"]
    return out, li, lm


# ----------------------------------------------------------------------------
# main
# ----------------------------------------------------------------------------
if __name__ == "__main__":
    # small, module-consistent shapes
    B = 2
    C, H, W = 4, 16, 16          # image (NCHW)
    N_NUM = 8                    # numeric metadata features
    N_CAT, CAT_CARD = 3, 5       # categorical metadata features, cardinality each
    F_IMG = 32                   # image_model.num_features
    F_META = 16                  # meta_model.num_features
    NUM_CLASSES = 2

    key = jax.random.PRNGKey(0)
    keys = jax.random.split(key, 12)

    # deterministic parameters
    w_img, b_img = _linear_init(keys[0], C, F_IMG)
    w_meta, b_meta = _linear_init(keys[1], N_NUM + N_CAT * CAT_CARD, F_META)
    w1i, b1i = _linear_init(keys[2], F_IMG, NUM_CLASSES)          # inter_ce_image.proj_1
    w2i, b2i = _linear_init(keys[3], NUM_CLASSES, F_IMG)          # inter_ce_image.proj_2
    w1m, b1m = _linear_init(keys[4], F_META, NUM_CLASSES)         # inter_ce_meta.proj_1
    w2m, b2m = _linear_init(keys[5], NUM_CLASSES, F_META)         # inter_ce_meta.proj_2
    w_head, bh = _linear_init(keys[6], F_IMG + F_META, NUM_CLASSES)
    params = dict(
        w_img=w_img, b_img=b_img, w_meta=w_meta, b_meta=b_meta,
        w1i=w1i, b1i=b1i, w2i=w2i, b2i=b2i,
        w1m=w1m, b1m=b1m, w2m=w2m, b2m=b2m,
        whi=w_head[:F_IMG], whm=w_head[F_IMG:], bh=bh,
    )
    kparams = prepare_kernel_params(params, N_NUM, NUM_CLASSES)

    # deterministic inputs
    image = jax.random.normal(keys[7], (B, C, H, W), jnp.float32)
    metadata_num = jax.random.normal(keys[8], (B, N_NUM), jnp.float32)
    metadata_cat = jax.random.randint(keys[9], (B, N_CAT), 0, CAT_CARD)
    metadata_cat_onehot = jax.nn.one_hot(metadata_cat, CAT_CARD).reshape(B, N_CAT * CAT_CARD)

    out, img_logits, meta_logits = isic_model_forward(
        image, metadata_num, metadata_cat_onehot, kparams, num_classes=NUM_CLASSES
    )
    jax.block_until_ready((out, img_logits, meta_logits))

    ref_out, ref_li, ref_lm = reference_forward(
        image, metadata_num, metadata_cat_onehot, params
    )
    # tolerance loosened slightly for pl.reciprocal(approx=True) in softmax
    assert jnp.allclose(out, ref_out, atol=2e-3, rtol=2e-3)
    assert jnp.allclose(img_logits, ref_li, atol=2e-3, rtol=2e-3)
    assert jnp.allclose(meta_logits, ref_lm, atol=2e-3, rtol=2e-3)

    print("KERNEL_OK")
</pallas_src>

<mosaic_0001>
module attributes {stable_mosaic.version = 11 : i64} {
  func.func @_fused_isic_kernel(%arg0: i32, %arg1: memref<8x4x256xf32, #tpu.memory_space<vmem>>, %arg2: memref<8x8xf32, #tpu.memory_space<vmem>>, %arg3: memref<8x15xf32, #tpu.memory_space<vmem>>, %arg4: memref<4x32xf32, #tpu.memory_space<vmem>>, %arg5: memref<1x32xf32, #tpu.memory_space<vmem>>, %arg6: memref<8x16xf32, #tpu.memory_space<vmem>>, %arg7: memref<15x16xf32, #tpu.memory_space<vmem>>, %arg8: memref<1x16xf32, #tpu.memory_space<vmem>>, %arg9: memref<32x128xf32, #tpu.memory_space<vmem>>, %arg10: memref<1x128xf32, #tpu.memory_space<vmem>>, %arg11: memref<128x32xf32, #tpu.memory_space<vmem>>, %arg12: memref<1x32xf32, #tpu.memory_space<vmem>>, %arg13: memref<16x128xf32, #tpu.memory_space<vmem>>, %arg14: memref<1x128xf32, #tpu.memory_space<vmem>>, %arg15: memref<128x16xf32, #tpu.memory_space<vmem>>, %arg16: memref<1x16xf32, #tpu.memory_space<vmem>>, %arg17: memref<32x128xf32, #tpu.memory_space<vmem>>, %arg18: memref<16x128xf32, #tpu.memory_space<vmem>>, %arg19: memref<1x128xf32, #tpu.memory_space<vmem>>, %arg20: memref<3x8x128xf32, #tpu.memory_space<vmem>>, %arg21: memref<8x4xf32, #tpu.memory_space<vmem>>) attributes {dimension_semantics = [#tpu.dimension_semantics<arbitrary>], iteration_bounds = array<i64: 1>, scalar_prefetch = 0 : i64, scratch_operands = 1 : i64, tpu.core_type = #tpu.core_type<tc>, window_params = [{transform_indices = @transform_0, window_bounds = array<i64: 8, 4, 256>}, {pipeline_mode = #tpu.pipeline_mode<synchronous>, transform_indices = @transform_1, window_bounds = array<i64: 8, 8>}, {pipeline_mode = #tpu.pipeline_mode<synchronous>, transform_indices = @transform_2, window_bounds = array<i64: 8, 15>}, {pipeline_mode = #tpu.pipeline_mode<synchronous>, transform_indices = @transform_3, window_bounds = array<i64: 4, 32>}, {pipeline_mode = #tpu.pipeline_mode<synchronous>, transform_indices = @transform_4, window_bounds = array<i64: 1, 32>}, {pipeline_mode = #tpu.pipeline_mode<synchronous>, transform_indices = @transform_5, window_bounds = array<i64: 8, 16>}, {pipeline_mode = #tpu.pipeline_mode<synchronous>, transform_indices = @transform_6, window_bounds = array<i64: 15, 16>}, {pipeline_mode = #tpu.pipeline_mode<synchronous>, transform_indices = @transform_7, window_bounds = array<i64: 1, 16>}, {pipeline_mode = #tpu.pipeline_mode<synchronous>, transform_indices = @transform_8, window_bounds = array<i64: 32, 128>}, {pipeline_mode = #tpu.pipeline_mode<synchronous>, transform_indices = @transform_9, window_bounds = array<i64: 1, 128>}, {pipeline_mode = #tpu.pipeline_mode<synchronous>, transform_indices = @transform_10, window_bounds = array<i64: 128, 32>}, {pipeline_mode = #tpu.pipeline_mode<synchronous>, transform_indices = @transform_11, window_bounds = array<i64: 1, 32>}, {pipeline_mode = #tpu.pipeline_mode<synchronous>, transform_indices = @transform_12, window_bounds = array<i64: 16, 128>}, {pipeline_mode = #tpu.pipeline_mode<synchronous>, transform_indices = @transform_13, window_bounds = array<i64: 1, 128>}, {pipeline_mode = #tpu.pipeline_mode<synchronous>, transform_indices = @transform_14, window_bounds = array<i64: 128, 16>}, {pipeline_mode = #tpu.pipeline_mode<synchronous>, transform_indices = @transform_15, window_bounds = array<i64: 1, 16>}, {pipeline_mode = #tpu.pipeline_mode<synchronous>, transform_indices = @transform_16, window_bounds = array<i64: 32, 128>}, {pipeline_mode = #tpu.pipeline_mode<synchronous>, transform_indices = @transform_17, window_bounds = array<i64: 16, 128>}, {pipeline_mode = #tpu.pipeline_mode<synchronous>, transform_indices = @transform_18, window_bounds = array<i64: 1, 128>}, {pipeline_mode = #tpu.pipeline_mode<synchronous>, transform_indices = @transform_19, window_bounds = array<i64: 3, 8, 128>}]} {
    %c0_i32 = arith.constant 0 : i32
    %0 = arith.cmpi eq, %arg0, %c0_i32 : i32
    %1 = arith.extui %0 : i1 to i32
    %c0_i32_0 = arith.constant 0 : i32
    %2 = arith.cmpi ne, %1, %c0_i32_0 : i32
    scf.if %2 {
      %cst_9 = arith.constant 0.000000e+00 : f32
      %11 = vector.broadcast %cst_9 : f32 to vector<8x4xf32>
      %c0_10 = arith.constant 0 : index
      %c0_11 = arith.constant 0 : index
      %12 = vector.load %arg21[%c0_10, %c0_11] : memref<8x4xf32, #tpu.memory_space<vmem>>, vector<8x4xf32>
      tpu.vector_store %arg21[%c0_10, %c0_11], %11 {strides = array<i32>} : memref<8x4xf32, #tpu.memory_space<vmem>>, vector<8x4xf32>,
    } else {
    }
    %c0 = arith.constant 0 : index
    %c0_1 = arith.constant 0 : index
    %3 = vector.load %arg21[%c0, %c0_1] : memref<8x4xf32, #tpu.memory_space<vmem>>, vector<8x4xf32>
    %c0_2 = arith.constant 0 : index
    %c0_3 = arith.constant 0 : index
    %c0_4 = arith.constant 0 : index
    %4 = vector.load %arg1[%c0_2, %c0_3, %c0_4] : memref<8x4x256xf32, #tpu.memory_space<vmem>>, vector<8x4x256xf32>
    %cst = arith.constant dense<0.000000e+00> : vector<8x4xf32>
    %5 = vector.multi_reduction <add>, %4, %cst [2] : vector<8x4x256xf32> to vector<8x4xf32>
    %6 = arith.addf %3, %5 : vector<8x4xf32>
    %c0_5 = arith.constant 0 : index
    %c0_6 = arith.constant 0 : index
    %7 = vector.load %arg21[%c0_5, %c0_6] : memref<8x4xf32, #tpu.memory_space<vmem>>, vector<8x4xf32>
    tpu.vector_store %arg21[%c0_5, %c0_6], %6 {strides = array<i32>} : memref<8x4xf32, #tpu.memory_space<vmem>>, vector<8x4xf32>,
    %c0_i32_7 = arith.constant 0 : i32
    %8 = arith.cmpi eq, %arg0, %c0_i32_7 : i32
    %9 = arith.extui %8 : i1 to i32
    %c0_i32_8 = arith.constant 0 : i32
    %10 = arith.cmpi ne, %9, %c0_i32_8 : i32
    scf.if %10 {
      %c0_9 = arith.constant 0 : index
      %c0_10 = arith.constant 0 : index
      %11 = vector.load %arg21[%c0_9, %c0_10] : memref<8x4xf32, #tpu.memory_space<vmem>>, vector<8x4xf32>
      %cst_11 = arith.constant 3.906250e-03 : f32
      %12 = vector.broadcast %cst_11 : f32 to vector<8x4xf32>
      %13 = arith.mulf %11, %12 : vector<8x4xf32>
      %c0_12 = arith.constant 0 : index
      %c0_13 = arith.constant 0 : index
      %14 = vector.load %arg4[%c0_12, %c0_13] : memref<4x32xf32, #tpu.memory_space<vmem>>, vector<4x32xf32>
      %cst_14 = arith.constant dense<0.000000e+00> : vector<8x32xf32>
      %15 = tpu.matmul %13, %14, %cst_14 {dimension_numbers = #tpu.dot_dimension_numbers<[1], [0], [0], [1], [0, 0, 1, 1], [], []>} : vector<8x4xf32>, vector<4x32xf32>, vector<8x32xf32> -> vector<8x32xf32>
      %c0_15 = arith.constant 0 : index
      %c0_16 = arith.constant 0 : index
      %16 = vector.load %arg5[%c0_15, %c0_16] : memref<1x32xf32, #tpu.memory_space<vmem>>, vector<1x32xf32>
      %17 = vector.broadcast %16 : vector<1x32xf32> to vector<8x32xf32>
      %18 = arith.addf %15, %17 : vector<8x32xf32>
      %c0_17 = arith.constant 0 : index
      %c0_18 = arith.constant 0 : index
      %19 = vector.load %arg2[%c0_17, %c0_18] : memref<8x8xf32, #tpu.memory_space<vmem>>, vector<8x8xf32>
      %c0_19 = arith.constant 0 : index
      %c0_20 = arith.constant 0 : index
      %20 = vector.load %arg6[%c0_19, %c0_20] : memref<8x16xf32, #tpu.memory_space<vmem>>, vector<8x16xf32>
      %cst_21 = arith.constant dense<0.000000e+00> : vector<8x16xf32>
      %21 = tpu.matmul %19, %20, %cst_21 {dimension_numbers = #tpu.dot_dimension_numbers<[1], [0], [0], [1], [0, 0, 1, 1], [], []>} : vector<8x8xf32>, vector<8x16xf32>, vector<8x16xf32> -> vector<8x16xf32>
      %c0_22 = arith.constant 0 : index
      %c0_23 = arith.constant 0 : index
      %22 = vector.load %arg3[%c0_22, %c0_23] : memref<8x15xf32, #tpu.memory_space<vmem>>, vector<8x15xf32>
      %c0_24 = arith.constant 0 : index
      %c0_25 = arith.constant 0 : index
      %23 = vector.load %arg7[%c0_24, %c0_25] : memref<15x16xf32, #tpu.memory_space<vmem>>, vector<15x16xf32>
      %cst_26 = arith.constant dense<0.000000e+00> : vector<8x16xf32>
      %24 = tpu.matmul %22, %23, %cst_26 {dimension_numbers = #tpu.dot_dimension_numbers<[1], [0], [0], [1], [0, 0, 1, 1], [], []>} : vector<8x15xf32>, vector<15x16xf32>, vector<8x16xf32> -> vector<8x16xf32>
      %25 = arith.addf %21, %24 : vector<8x16xf32>
      %c0_27 = arith.constant 0 : index
      %c0_28 = arith.constant 0 : index
      %26 = vector.load %arg8[%c0_27, %c0_28] : memref<1x16xf32, #tpu.memory_space<vmem>>, vector<1x16xf32>
      %27 = vector.broadcast %26 : vector<1x16xf32> to vector<8x16xf32>
      %28 = arith.addf %25, %27 : vector<8x16xf32>
      %cst_29 = arith.constant 0.000000e+00 : f32
      %29 = vector.broadcast %cst_29 : f32 to vector<8x16xf32>
      %30 = arith.maximumf %28, %29 : vector<8x16xf32>
      %c0_30 = arith.constant 0 : index
      %c0_31 = arith.constant 0 : index
      %31 = vector.load %arg9[%c0_30, %c0_31] : memref<32x128xf32, #tpu.memory_space<vmem>>, vector<32x128xf32>
      %cst_32 = arith.constant dense<0.000000e+00> : vector<8x128xf32>
      %32 = tpu.matmul %18, %31, %cst_32 {dimension_numbers = #tpu.dot_dimension_numbers<[1], [0], [0], [1], [0, 0, 1, 1], [], []>} : vector<8x32xf32>, vector<32x128xf32>, vector<8x128xf32> -> vector<8x128xf32>
      %c0_33 = arith.constant 0 : index
      %c0_34 = arith.constant 0 : index
      %33 = vector.load %arg10[%c0_33, %c0_34] : memref<1x128xf32, #tpu.memory_space<vmem>>, vector<1x128xf32>
      %34 = vector.broadcast %33 : vector<1x128xf32> to vector<8x128xf32>
      %35 = arith.addf %32, %34 : vector<8x128xf32>
      %36 = tpu.iota {dimensions = array<i32: 1>} : vector<8x128xi32>
      %c2_i32 = arith.constant 2 : i32
      %37 = vector.broadcast %c2_i32 : i32 to vector<8x128xi32>
      %38 = arith.cmpi slt, %36, %37 : vector<8x128xi32>
      %cst_35 = arith.constant -1.000000e+30 : f32
      %39 = vector.broadcast %cst_35 : f32 to vector<8x128xf32>
      %40 = arith.select %38, %35, %39 : vector<8x128xi1>, vector<8x128xf32>
      %cst_36 = arith.constant dense<0xFF800000> : vector<8xf32>
      %41 = vector.multi_reduction <maximumf>, %40, %cst_36 [1] : vector<8x128xf32> to vector<8xf32>
      %42 = vector.shape_cast %41 : vector<8xf32> to vector<8x1xf32>
      %43 = vector.broadcast %42 : vector<8x1xf32> to vector<8x128xf32>
      %44 = arith.subf %40, %43 : vector<8x128xf32>
      %45 = math.exp %44 : vector<8x128xf32>
      %cst_37 = arith.constant dense<0.000000e+00> : vector<8xf32>
      %46 = vector.multi_reduction <add>, %45, %cst_37 [1] : vector<8x128xf32> to vector<8xf32>
      %47 = vector.shape_cast %46 : vector<8xf32> to vector<8x1xf32>
      %48 = tpu.reciprocal %47 {approx = true} : vector<8x1xf32> -> vector<8x1xf32>
      %49 = vector.broadcast %48 : vector<8x1xf32> to vector<8x128xf32>
      %50 = arith.mulf %45, %49 : vector<8x128xf32>
      %c0_38 = arith.constant 0 : index
      %c0_39 = arith.constant 0 : index
      %51 = vector.load %arg11[%c0_38, %c0_39] : memref<128x32xf32, #tpu.memory_space<vmem>>, vector<128x32xf32>
      %cst_40 = arith.constant dense<0.000000e+00> : vector<8x32xf32>
      %52 = tpu.matmul %50, %51, %cst_40 {dimension_numbers = #tpu.dot_dimension_numbers<[1], [0], [0], [1], [0, 0, 1, 1], [], []>} : vector<8x128xf32>, vector<128x32xf32>, vector<8x32xf32> -> vector<8x32xf32>
      %53 = arith.addf %18, %52 : vector<8x32xf32>
      %c0_41 = arith.constant 0 : index
      %c0_42 = arith.constant 0 : index
      %54 = vector.load %arg12[%c0_41, %c0_42] : memref<1x32xf32, #tpu.memory_space<vmem>>, vector<1x32xf32>
      %55 = vector.broadcast %54 : vector<1x32xf32> to vector<8x32xf32>
      %56 = arith.addf %53, %55 : vector<8x32xf32>
      %c0_43 = arith.constant 0 : index
      %c0_44 = arith.constant 0 : index
      %57 = vector.load %arg13[%c0_43, %c0_44] : memref<16x128xf32, #tpu.memory_space<vmem>>, vector<16x128xf32>
      %cst_45 = arith.constant dense<0.000000e+00> : vector<8x128xf32>
      %58 = tpu.matmul %30, %57, %cst_45 {dimension_numbers = #tpu.dot_dimension_numbers<[1], [0], [0], [1], [0, 0, 1, 1], [], []>} : vector<8x16xf32>, vector<16x128xf32>, vector<8x128xf32> -> vector<8x128xf32>
      %c0_46 = arith.constant 0 : index
      %c0_47 = arith.constant 0 : index
      %59 = vector.load %arg14[%c0_46, %c0_47] : memref<1x128xf32, #tpu.memory_space<vmem>>, vector<1x128xf32>
      %60 = vector.broadcast %59 : vector<1x128xf32> to vector<8x128xf32>
      %61 = arith.addf %58, %60 : vector<8x128xf32>
      %62 = tpu.iota {dimensions = array<i32: 1>} : vector<8x128xi32>
      %c2_i32_48 = arith.constant 2 : i32
      %63 = vector.broadcast %c2_i32_48 : i32 to vector<8x128xi32>
      %64 = arith.cmpi slt, %62, %63 : vector<8x128xi32>
      %cst_49 = arith.constant -1.000000e+30 : f32
      %65 = vector.broadcast %cst_49 : f32 to vector<8x128xf32>
      %66 = arith.select %64, %61, %65 : vector<8x128xi1>, vector<8x128xf32>
      %cst_50 = arith.constant dense<0xFF800000> : vector<8xf32>
      %67 = vector.multi_reduction <maximumf>, %66, %cst_50 [1] : vector<8x128xf32> to vector<8xf32>
      %68 = vector.shape_cast %67 : vector<8xf32> to vector<8x1xf32>
      %69 = vector.broadcast %68 : vector<8x1xf32> to vector<8x128xf32>
      %70 = arith.subf %66, %69 : vector<8x128xf32>
      %71 = math.exp %70 : vector<8x128xf32>
      %cst_51 = arith.constant dense<0.000000e+00> : vector<8xf32>
      %72 = vector.multi_reduction <add>, %71, %cst_51 [1] : vector<8x128xf32> to vector<8xf32>
      %73 = vector.shape_cast %72 : vector<8xf32> to vector<8x1xf32>
      %74 = tpu.reciprocal %73 {approx = true} : vector<8x1xf32> -> vector<8x1xf32>
      %75 = vector.broadcast %74 : vector<8x1xf32> to vector<8x128xf32>
      %76 = arith.mulf %71, %75 : vector<8x128xf32>
      %c0_52 = arith.constant 0 : index
      %c0_53 = arith.constant 0 : index
      %77 = vector.load %arg15[%c0_52, %c0_53] : memref<128x16xf32, #tpu.memory_space<vmem>>, vector<128x16xf32>
      %cst_54 = arith.constant dense<0.000000e+00> : vector<8x16xf32>
      %78 = tpu.matmul %76, %77, %cst_54 {dimension_numbers = #tpu.dot_dimension_numbers<[1], [0], [0], [1], [0, 0, 1, 1], [], []>} : vector<8x128xf32>, vector<128x16xf32>, vector<8x16xf32> -> vector<8x16xf32>
      %79 = arith.addf %30, %78 : vector<8x16xf32>
      %c0_55 = arith.constant 0 : index
      %c0_56 = arith.constant 0 : index
      %80 = vector.load %arg16[%c0_55, %c0_56] : memref<1x16xf32, #tpu.memory_space<vmem>>, vector<1x16xf32>
      %81 = vector.broadcast %80 : vector<1x16xf32> to vector<8x16xf32>
      %82 = arith.addf %79, %81 : vector<8x16xf32>
      %c0_57 = arith.constant 0 : index
      %c0_58 = arith.constant 0 : index
      %83 = vector.load %arg17[%c0_57, %c0_58] : memref<32x128xf32, #tpu.memory_space<vmem>>, vector<32x128xf32>
      %cst_59 = arith.constant dense<0.000000e+00> : vector<8x128xf32>
      %84 = tpu.matmul %56, %83, %cst_59 {dimension_numbers = #tpu.dot_dimension_numbers<[1], [0], [0], [1], [0, 0, 1, 1], [], []>} : vector<8x32xf32>, vector<32x128xf32>, vector<8x128xf32> -> vector<8x128xf32>
      %c0_60 = arith.constant 0 : index
      %c0_61 = arith.constant 0 : index
      %85 = vector.load %arg18[%c0_60, %c0_61] : memref<16x128xf32, #tpu.memory_space<vmem>>, vector<16x128xf32>
      %cst_62 = arith.constant dense<0.000000e+00> : vector<8x128xf32>
      %86 = tpu.matmul %82, %85, %cst_62 {dimension_numbers = #tpu.dot_dimension_numbers<[1], [0], [0], [1], [0, 0, 1, 1], [], []>} : vector<8x16xf32>, vector<16x128xf32>, vector<8x128xf32> -> vector<8x128xf32>
      %87 = arith.addf %84, %86 : vector<8x128xf32>
      %c0_63 = arith.constant 0 : index
      %c0_64 = arith.constant 0 : index
      %88 = vector.load %arg19[%c0_63, %c0_64] : memref<1x128xf32, #tpu.memory_space<vmem>>, vector<1x128xf32>
      %89 = vector.broadcast %88 : vector<1x128xf32> to vector<8x128xf32>
      %90 = arith.addf %87, %89 : vector<8x128xf32>
      %c0_65 = arith.constant 0 : index
      %c0_66 = arith.constant 0 : index
      %c0_67 = arith.constant 0 : index
      %91 = vector.load %arg20[%c0_65, %c0_66, %c0_67] : memref<3x8x128xf32, #tpu.memory_space<vmem>>, vector<1x8x128xf32>
      %92 = vector.shape_cast %91 : vector<1x8x128xf32> to vector<8x128xf32>
      %93 = vector.shape_cast %90 : vector<8x128xf32> to vector<1x8x128xf32>
      tpu.vector_store %arg20[%c0_65, %c0_66, %c0_67], %93 {strides = array<i32>} : memref<3x8x128xf32, #tpu.memory_space<vmem>>, vector<1x8x128xf32>,
      %c1 = arith.constant 1 : index
      %c0_68 = arith.constant 0 : index
      %c0_69 = arith.constant 0 : index
      %94 = vector.load %arg20[%c1, %c0_68, %c0_69] : memref<3x8x128xf32, #tpu.memory_space<vmem>>, vector<1x8x128xf32>
      %95 = vector.shape_cast %94 : vector<1x8x128xf32> to vector<8x128xf32>
      %96 = vector.shape_cast %35 : vector<8x128xf32> to vector<1x8x128xf32>
      tpu.vector_store %arg20[%c1, %c0_68, %c0_69], %96 {strides = array<i32>} : memref<3x8x128xf32, #tpu.memory_space<vmem>>, vector<1x8x128xf32>,
      %c2 = arith.constant 2 : index
      %c0_70 = arith.constant 0 : index
      %c0_71 = arith.constant 0 : index
      %97 = vector.load %arg20[%c2, %c0_70, %c0_71] : memref<3x8x128xf32, #tpu.memory_space<vmem>>, vector<1x8x128xf32>
      %98 = vector.shape_cast %97 : vector<1x8x128xf32> to vector<8x128xf32>
      %99 = vector.shape_cast %61 : vector<8x128xf32> to vector<1x8x128xf32>
      tpu.vector_store %arg20[%c2, %c0_70, %c0_71], %99 {strides = array<i32>} : memref<3x8x128xf32, #tpu.memory_space<vmem>>, vector<1x8x128xf32>,
    } else {
    }
    return
  }
  func.func @transform_0(%arg0: i32) -> (i32, i32, i32) {
    %c0_i32 = arith.constant 0 : i32
    %c0_i32_0 = arith.constant 0 : i32
    %c0_i32_1 = arith.constant 0 : i32
    return %c0_i32, %c0_i32_0, %arg0 : i32, i32, i32
  }
  func.func @transform_1(%arg0: i32) -> (i32, i32) {
    %c0_i32 = arith.constant 0 : i32
    %c0_i32_0 = arith.constant 0 : i32
    %c0_i32_1 = arith.constant 0 : i32
    return %c0_i32, %c0_i32_0 : i32, i32
  }
  func.func @transform_2(%arg0: i32) -> (i32, i32) {
    %c0_i32 = arith.constant 0 : i32
    %c0_i32_0 = arith.constant 0 : i32
    %c0_i32_1 = arith.constant 0 : i32
    return %c0_i32, %c0_i32_0 : i32, i32
  }
  func.func @transform_3(%arg0: i32) -> (i32, i32) {
    %c0_i32 = arith.constant 0 : i32
    %c0_i32_0 = arith.constant 0 : i32
    %c0_i32_1 = arith.constant 0 : i32
    return %c0_i32, %c0_i32_0 : i32, i32
  }
  func.func @transform_4(%arg0: i32) -> (i32, i32) {
    %c0_i32 = arith.constant 0 : i32
    %c0_i32_0 = arith.constant 0 : i32
    %c0_i32_1 = arith.constant 0 : i32
    return %c0_i32, %c0_i32_0 : i32, i32
  }
  func.func @transform_5(%arg0: i32) -> (i32, i32) {
    %c0_i32 = arith.constant 0 : i32
    %c0_i32_0 = arith.constant 0 : i32
    %c0_i32_1 = arith.constant 0 : i32
    return %c0_i32, %c0_i32_0 : i32, i32
  }
  func.func @transform_6(%arg0: i32) -> (i32, i32) {
    %c0_i32 = arith.constant 0 : i32
    %c0_i32_0 = arith.constant 0 : i32
    %c0_i32_1 = arith.constant 0 : i32
    return %c0_i32, %c0_i32_0 : i32, i32
  }
  func.func @transform_7(%arg0: i32) -> (i32, i32) {
    %c0_i32 = arith.constant 0 : i32
    %c0_i32_0 = arith.constant 0 : i32
    %c0_i32_1 = arith.constant 0 : i32
    return %c0_i32, %c0_i32_0 : i32, i32
  }
  func.func @transform_8(%arg0: i32) -> (i32, i32) {
    %c0_i32 = arith.constant 0 : i32
    %c0_i32_0 = arith.constant 0 : i32
    %c0_i32_1 = arith.constant 0 : i32
    return %c0_i32, %c0_i32_0 : i32, i32
  }
  func.func @transform_9(%arg0: i32) -> (i32, i32) {
    %c0_i32 = arith.constant 0 : i32
    %c0_i32_0 = arith.constant 0 : i32
    %c0_i32_1 = arith.constant 0 : i32
    return %c0_i32, %c0_i32_0 : i32, i32
  }
  func.func @transform_10(%arg0: i32) -> (i32, i32) {
    %c0_i32 = arith.constant 0 : i32
    %c0_i32_0 = arith.constant 0 : i32
    %c0_i32_1 = arith.constant 0 : i32
    return %c0_i32, %c0_i32_0 : i32, i32
  }
  func.func @transform_11(%arg0: i32) -> (i32, i32) {
    %c0_i32 = arith.constant 0 : i32
    %c0_i32_0 = arith.constant 0 : i32
    %c0_i32_1 = arith.constant 0 : i32
    return %c0_i32, %c0_i32_0 : i32, i32
  }
  func.func @transform_12(%arg0: i32) -> (i32, i32) {
    %c0_i32 = arith.constant 0 : i32
    %c0_i32_0 = arith.constant 0 : i32
    %c0_i32_1 = arith.constant 0 : i32
    return %c0_i32, %c0_i32_0 : i32, i32
  }
  func.func @transform_13(%arg0: i32) -> (i32, i32) {
    %c0_i32 = arith.constant 0 : i32
    %c0_i32_0 = arith.constant 0 : i32
    %c0_i32_1 = arith.constant 0 : i32
    return %c0_i32, %c0_i32_0 : i32, i32
  }
  func.func @transform_14(%arg0: i32) -> (i32, i32) {
    %c0_i32 = arith.constant 0 : i32
    %c0_i32_0 = arith.constant 0 : i32
    %c0_i32_1 = arith.constant 0 : i32
    return %c0_i32, %c0_i32_0 : i32, i32
  }
  func.func @transform_15(%arg0: i32) -> (i32, i32) {
    %c0_i32 = arith.constant 0 : i32
    %c0_i32_0 = arith.constant 0 : i32
    %c0_i32_1 = arith.constant 0 : i32
    return %c0_i32, %c0_i32_0 : i32, i32
  }
  func.func @transform_16(%arg0: i32) -> (i32, i32) {
    %c0_i32 = arith.constant 0 : i32
    %c0_i32_0 = arith.constant 0 : i32
    %c0_i32_1 = arith.constant 0 : i32
    return %c0_i32, %c0_i32_0 : i32, i32
  }
  func.func @transform_17(%arg0: i32) -> (i32, i32) {
    %c0_i32 = arith.constant 0 : i32
    %c0_i32_0 = arith.constant 0 : i32
    %c0_i32_1 = arith.constant 0 : i32
    return %c0_i32, %c0_i32_0 : i32, i32
  }
  func.func @transform_18(%arg0: i32) -> (i32, i32) {
    %c0_i32 = arith.constant 0 : i32
    %c0_i32_0 = arith.constant 0 : i32
    %c0_i32_1 = arith.constant 0 : i32
    return %c0_i32, %c0_i32_0 : i32, i32
  }
  func.func @transform_19(%arg0: i32) -> (i32, i32, i32) {
    %c0_i32 = arith.constant 0 : i32
    %c0_i32_0 = arith.constant 0 : i32
    %c0_i32_1 = arith.constant 0 : i32
    %c0_i32_2 = arith.constant 0 : i32
    return %c0_i32, %c0_i32_0, %c0_i32_1 : i32, i32, i32
  }
}

</mosaic_0001>

<bundles_post_ra>
// kernel: isic_model_forward.1
= control target key start
LH: loop header
LB: loop body
LE: loop exit
PB: predicated region body
PF: predicated region fallthrough
CT: control target
= control target key end

     0   :  { %vm101_vm0 = vcmask 1043456   ;;  %vm66_vm1 = vcmask 31744   ;;  %v1221_v40 = vmov 0.0   ;;  %vm300_vm2 = vcmask 1046528   ;;  %s1641_s0 = inlined_call_operand.vmem [shape: f32[8,4,256], index: 0, kind: input, shape index: {}]   ;;  %s1642_s3 = inlined_call_operand.vmem [shape: f32[4,32], index: 3, kind: input, shape index: {}]   ;;  %s1643_s6 = inlined_call_operand.vmem [shape: f32[15,16], index: 6, kind: input, shape index: {}]   ;;  %s1644_s2 = inlined_call_operand.vmem [shape: f32[8,15], index: 2, kind: input, shape index: {}]   ;;  %s1645_s8 = inlined_call_operand.vmem [shape: f32[32,128], index: 8, kind: input, shape index: {}]   ;;  %s1646_s5 = inlined_call_operand.vmem [shape: f32[8,16], index: 5, kind: input, shape index: {}]   ;;  %s1647_s1 = inlined_call_operand.vmem [shape: f32[8,8], index: 1, kind: input, shape index: {}]   ;;  %s1648_s4 = inlined_call_operand.vmem [shape: f32[1,32], index: 4, kind: input, shape index: {}]   ;;  %s1649_s12 = inlined_call_operand.vmem [shape: f32[16,128], index: 12, kind: input, shape index: {}]   ;;  %s1650_s7 = inlined_call_operand.vmem [shape: f32[1,16], index: 7, kind: input, shape index: {}]   ;;  %s1651_s9 = inlined_call_operand.vmem [shape: f32[1,128], index: 9, kind: input, shape index: {}]   ;;  %s1652_s19 = inlined_call_operand.vmem [shape: f32[3,8,128], index: 19, kind: output, shape index: {}]   ;;  %s1653_s13 = inlined_call_operand.vmem [shape: f32[1,128], index: 13, kind: input, shape index: {}]   ;;  %s1654_s10 = inlined_call_operand.vmem [shape: f32[128,32], index: 10, kind: input, shape index: {}]   ;;  %s1655_s14 = inlined_call_operand.vmem [shape: f32[128,16], index: 14, kind: input, shape index: {}]   ;;  %s1656_s17 = inlined_call_operand.vmem [shape: f32[16,128], index: 17, kind: input, shape index: {}]   ;;  %s1657_s15 = inlined_call_operand.vmem [shape: f32[1,16], index: 15, kind: input, shape index: {}]   ;;  %s1658_s16 = inlined_call_operand.vmem [shape: f32[32,128], index: 16, kind: input, shape index: {}]   ;;  %s1659_s11 = inlined_call_operand.vmem [shape: f32[1,32], index: 11, kind: input, shape index: {}]   ;;  %s1660_s18 = inlined_call_operand.vmem [shape: f32[1,128], index: 18, kind: input, shape index: {}]  }
   0x1   :  { %1663 = sst [smem:[#allocation3_spill]] %s1641_s0  ;;  %1080 = vmatprep.subr.mxu0 %v1221_v40  ;;  %1085 = vmatprep.subr.mxu1 %v1221_v40  ;;  %67 = vst.msk [vmem:[#allocation2] sm:$0xff] %vm66_vm1, %v1221_v40  ;;  %vm1222_vm3 = vmmov 0   ;;  %vm296_vm4 = vcmask 121856   ;;  %v460_v45 = vld [vmem:[%s1645_s8 + $0x18] sm:$0xff]  ;;  %v459_v46 = vld [vmem:[%s1645_s8 + $0x10] sm:$0xff]  ;;  %v150_v47 = vlaneseq }
   0x2   :  { %1664 = sst [smem:[#allocation4_spill]] %s1642_s3  ;;  %1082 = vmatprep.mubr.msk.f32.mxu0 %vm1222_vm3, %v1221_v40  ;;  %1089 = vmatprep.mubr.msk.f32.mxu1 %vm1222_vm3, %v1221_v40  ;;  %vm184_vm5 = vcmask 1041409   ;;  %vm186_vm6 = vcmask 1042434   ;;  %vm188_vm7 = vcmask 1043459   ;;  %vm190_vm8 = vcmask 1044484  }
   0x3   :  { %1665 = sst [smem:[#allocation5_spill]] %s1643_s6  ;;  %v1397_v48 = vand.u32 127, %v150_v47  ;;  %v153_v49 = vshrl.u32 %v150_v47, 7  ;;  %vm192_vm9 = vcmask 1045509   ;;  %vm194_vm10 = vcmask 1046534   ;;  %v755_v47 = vld [vmem:[%s1655_s14 + $0x70] sm:$0xff] }
   0x4   :  { %1666 = sst [smem:[#allocation6_spill]] %s1644_s2  ;;  %vm196_vm11 = vcmask 1047559   ;;  %vm374_vm12 = vcmask 64512   ;;  %vm468_vm13 = vcmask 261120   ;;  %vm657_vm14 = vcmask 130048  }
   0x5   :  { %s1667_s20 = sld [smem:[#allocation3_spill]]  ;;  %v154_v52 = vsub.s32 %v1397_v48, %v153_v49  ;;  %vm542_vm15 = vcmp.lt.s32.totalorder %v1397_v48, 2  ;;  %v754_v48 = vld [vmem:[%s1655_s14 + $0x68] sm:$0xff]  ;;  %v565_v49 = vld [vmem:[%s1654_s10 + $0x60] sm:$0xff] }
   0x6   :  { %s1668_s3 = sld [smem:[#allocation4_spill]] }
   0x7   :  { %s1669_s23 = sld [smem:[#allocation5_spill]] }
   0x8   :  { %s1670_s27 = sld [smem:[#allocation6_spill]] }
   0xb   :  { %v69_v0 = vld [vmem:[%s1667_s20] sm:$0xff]  ;;  %v71_v1 = vld [vmem:[%s1667_s20 + $0x10] sm:$0xff]  ;;  %v70_v2 = vld [vmem:[%s1667_s20 + $0x8] sm:$0xff] }
   0xc   :  { %v85_v3 = vcombine.high %v69_v0, %v69_v0  ;;  %v102_v4 = vsel %vm101_vm0, %v69_v0, 0.0  ;;  %v87_v5 = vcombine.high %v71_v1, %v71_v1  ;;  %v112_v6 = vsel %vm101_vm0, %v71_v1, 0.0  ;;  %v72_v7 = vld [vmem:[%s1667_s20 + $0x18] sm:$0xff]  ;;  %v73_v8 = vld [vmem:[%s1667_s20 + $0x20] sm:$0xff]  ;;  %v74_v12 = vld [vmem:[%s1667_s20 + $0x28] sm:$0xff] }
   0xd   :  { %v86_v9 = vcombine.high %v70_v2, %v70_v2  ;;  %v107_v10 = vsel %vm101_vm0, %v70_v2, 0.0  ;;  %v88_v11 = vcombine.high %v72_v7, %v72_v7  ;;  %v117_v15 = vsel %vm101_vm0, %v72_v7, 0.0  ;;  %v75_v21 = vld [vmem:[%s1667_s20 + $0x30] sm:$0xff]  ;;  %v76_v22 = vld [vmem:[%s1667_s20 + $0x38] sm:$0xff]  ;;  %v207_v41 = vld [vmem:[%s1668_s3] sm:$0xf] }
   0xe   :  { %v103_v13 = vsel %vm101_vm0, %v85_v3, 0.0  ;;  %v113_v14 = vsel %vm101_vm0, %v87_v5, 0.0  ;;  %v89_v16 = vcombine.high %v73_v8, %v73_v8  ;;  %v90_v23 = vcombine.high %v74_v12, %v74_v12  ;;  %v295_v42 = vld [vmem:[%s1669_s23 + $0x8] sm:$0x7f]  ;;  %1081 = vmatpush3.msk.msra.mxu0 %vm101_vm0, %v207_v41  ;;  %v294_v43 = vld [vmem:[%s1669_s23] sm:$0xff] }
   0xf   :  { %v104_v17 = vadd.f32 %v103_v13, %v102_v4  ;;  %v114_v18 = vadd.f32 %v113_v14, %v112_v6  ;;  %v108_v19 = vsel %vm101_vm0, %v86_v9, 0.0  ;;  %v118_v20 = vsel %vm101_vm0, %v88_v11, 0.0  ;;  %1086 = vmatpush3.msk.msra.mxu1 %vm300_vm2, %v295_v42  ;;  %1092 = vmatprep.subr.mxu0 %v1221_v40  ;;  %v293_v44 = vld [vmem:[%s1670_s27] sm:$0xff] }
  0x10   :  { %v109_v24 = vadd.f32 %v108_v19, %v107_v10  ;;  %v119_v25 = vadd.f32 %v118_v20, %v117_v15  ;;  %v122_v26 = vsel %vm101_vm0, %v73_v8, 0.0  ;;  %v123_v27 = vsel %vm101_vm0, %v89_v16, 0.0  ;;  %1087 = vmatprep.subr.mxu1 %v1221_v40  ;;  %v68_v8 = vld [vmem:[#allocation2] sm:$0xff]  ;;  %v458_v16 = vld [vmem:[%s1645_s8 + $0x8] sm:$0xff] }
  0x11   :  { %105 = vadd.xlane.f32.xlu0 %v104_v17  ;;  %115 = vadd.xlane.f32.xlu1 %v114_v18  ;;  %v127_v28 = vsel %vm101_vm0, %v74_v12, 0.0  ;;  %v128_v29 = vsel %vm101_vm0, %v90_v23, 0.0  ;;  %v91_v30 = vcombine.high %v75_v21, %v75_v21  ;;  %v92_v31 = vcombine.high %v76_v22, %v76_v22  ;;  %v292_v14 = vld [vmem:[%s1646_s5] sm:$0xff]  ;;  %v649_v23 = vld [vmem:[%s1649_s12 + $0x8] sm:$0xff] }
  0x12   :  { %v124_v32 = vadd.f32 %v123_v27, %v122_v26  ;;  %v129_v33 = vadd.f32 %v128_v29, %v127_v28  ;;  %v132_v34 = vsel %vm101_vm0, %v75_v21, 0.0  ;;  %v137_v36 = vsel %vm101_vm0, %v76_v22, 0.0  ;;  %1088 = vmatpush3.msra.mxu1 %v294_v43  ;;  %v291_v15 = vld [vmem:[%s1647_s1] sm:$0xff]  ;;  %v568_v43 = vld [vmem:[%s1654_s10 + $0x78] sm:$0xff] }
  0x13   :  { %v133_v35 = vsel %vm101_vm0, %v91_v30, 0.0  ;;  %v138_v37 = vsel %vm101_vm0, %v92_v31, 0.0  ;;  %1090 = vmatmul.mubr.msk.f32.vlgmr.msra.gmra.mxu1 %vm296_vm4, %v293_v44  ;;  %1097 = vmatprep.subr.mxu1 %v1221_v40  ;;  %v457_v17 = vld [vmem:[%s1645_s8] sm:$0xff]  ;;  %v567_v44 = vld [vmem:[%s1654_s10 + $0x70] sm:$0xff] }
  0x14   :  { %v134_v38 = vadd.f32 %v133_v35, %v132_v34  ;;  %v139_v39 = vadd.f32 %v138_v37, %v137_v36  ;;  %1105 = vmatprep.mubr.msk.f32.mxu1 %vm1222_vm3, %v1221_v40  ;;  %1098 = vmatpush3.msra.mxu1 %v460_v45  ;;  %v1005_v20 = vld [vmem:[%s1648_s4] ss:$0 sm:$0xff]  ;;  %v756_v45 = vld [vmem:[%s1655_s14 + $0x78] sm:$0xff] }
  0x15   :  { %110 = vadd.xlane.f32.xlu0 %v109_v24  ;;  %120 = vadd.xlane.f32.xlu1 %v119_v25  ;;  %v648_v25 = vld [vmem:[%s1649_s12] sm:$0xff] }
  0x16   :  { %1099 = vmatprep.subr.mxu1 %v1221_v40  ;;  %v1011_v27 = vld [vmem:[%s1650_s7] ss:$0 sm:$0xff] }
  0x17   :  { %1100 = vmatpush3.msra.mxu1 %v459_v46  ;;  %v1015_v37 = vld [vmem:[%s1653_s13] ss:$0 sm:$0xff]  ;;  %v566_v46 = vld [vmem:[%s1654_s10 + $0x68] sm:$0xff] }
  0x18   :  { %1101 = vmatprep.subr.mxu1 %v1221_v40 }
  0x19   :  { %125 = vadd.xlane.f32.xlu0 %v124_v32  ;;  %130 = vadd.xlane.f32.xlu1 %v129_v33  ;;  %v1012_v32 = vld [vmem:[%s1651_s9] ss:$0 sm:$0xff] }
  0x1a   :  { %1102 = vmatpush3.msra.mxu1 %v458_v16  ;;  %v743_v16 = vld [vmem:[%s1655_s14 + $0x10] sm:$0xff] }
  0x1b   :  { %1103 = vmatprep.subr.mxu1 %v1221_v40 }
  0x1c   :  { %1104 = vmatpush3.msra.mxu1 %v457_v17  ;;  %v742_v17 = vld [vmem:[%s1655_s14 + $0x8] sm:$0xff] }
  0x1d   :  { %135 = vadd.xlane.f32.xlu0 %v134_v38  ;;  %140 = vadd.xlane.f32.xlu1 %v139_v39 }
  0x1e   :  { %1143 = vmatprep.subr.mxu1 %v1221_v40 }
  0x9a   :  { %v106_v50 = vpop.xlane.xlu0 %105  ;;  %v116_v51 = vpop.xlane.xlu1 %115 }
  0x9b   :  { %v155_v55 = vrot.slane %v106_v50, %v154_v52  ;;  %v163_v58 = vrot.slane %v116_v51, %v154_v52  ;;  %v564_v50 = vld [vmem:[%s1654_s10 + $0x58] sm:$0xff]  ;;  %v563_v51 = vld [vmem:[%s1654_s10 + $0x50] sm:$0xff] }
  0x9e   :  { %v111_v53 = vpop.xlane.xlu0 %110  ;;  %v121_v54 = vpop.xlane.xlu1 %120 }
  0x9f   :  { %v159_v56 = vrot.slane %v111_v53, %v154_v52  ;;  %v167_v57 = vrot.slane %v121_v54, %v154_v52  ;;  %v561_v53 = vld [vmem:[%s1654_s10 + $0x40] sm:$0xff] }
  0xa1   :  { %v185_v59 = vsel %vm184_vm5, %v159_v56, %v155_v55 }
  0xa2   :  { %v187_v60 = vsel %vm186_vm6, %v163_v58, %v185_v59  ;;  %v126_v61 = vpop.xlane.xlu0 %125  ;;  %v131_v62 = vpop.xlane.xlu1 %130 }
  0xa3   :  { %v189_v63 = vsel %vm188_vm7, %v167_v57, %v187_v60  ;;  %v171_v0 = vrot.slane %v126_v61, %v154_v52  ;;  %v175_v1 = vrot.slane %v131_v62, %v154_v52  ;;  %v753_v62 = vld [vmem:[%s1655_s14 + $0x60] sm:$0xff] }
  0xa5   :  { %v191_v2 = vsel %vm190_vm8, %v171_v0, %v189_v63  ;;  %v560_v63 = vld [vmem:[%s1654_s10 + $0x38] sm:$0xff] }
  0xa6   :  { %v136_v3 = vpop.xlane.xlu0 %135  ;;  %v141_v4 = vpop.xlane.xlu1 %140  ;;  %v193_v7 = vsel %vm192_vm9, %v175_v1, %v191_v2  ;;  %v752_v0 = vld [vmem:[%s1655_s14 + $0x58] sm:$0xff]  ;;  %v559_v1 = vld [vmem:[%s1654_s10 + $0x30] sm:$0xff] }
  0xa7   :  { %v179_v5 = vrot.slane %v136_v3, %v154_v52  ;;  %v183_v6 = vrot.slane %v141_v4, %v154_v52  ;;  %v562_v52 = vld [vmem:[%s1654_s10 + $0x48] sm:$0xff]  ;;  %v751_v2 = vld [vmem:[%s1655_s14 + $0x50] sm:$0xff] }
  0xa8   :  { %v558_v3 = vld [vmem:[%s1654_s10 + $0x28] sm:$0xff] }
  0xa9   :  { %v195_v9 = vsel %vm194_vm10, %v179_v5, %v193_v7  ;;  %v750_v4 = vld [vmem:[%s1655_s14 + $0x48] sm:$0xff]  ;;  %v557_v5 = vld [vmem:[%s1654_s10 + $0x20] sm:$0xff]  ;;  %v556_v7 = vld [vmem:[%s1654_s10 + $0x18] sm:$0xff] }
  0xaa   :  { %v197_v10 = vsel %vm196_vm11, %v183_v6, %v195_v9  ;;  %v749_v6 = vld [vmem:[%s1655_s14 + $0x40] sm:$0xff]  ;;  %v555_v9 = vld [vmem:[%s1654_s10 + $0x10] sm:$0xff] }
  0xab   :  { %v199_v11 = vadd.f32 %v197_v10, %v68_v8  ;;  %v748_v8 = vld [vmem:[%s1655_s14 + $0x38] sm:$0xff]  ;;  %v747_v10 = vld [vmem:[%s1655_s14 + $0x30] sm:$0xff] }
  0xad   :  { %201 = vst.msk [vmem:[#allocation2] sm:$0xff] %vm66_vm1, %v199_v11  ;;  %v554_v11 = vld [vmem:[%s1654_s10 + $0x8] sm:$0xff] }
  0xb4   :  { %v205_v12 = vld [vmem:[#allocation2] sm:$0xff] }
  0xb5   :  { %v206_v13 = vmul.f32 0.00390625, %v205_v12  ;;  %v746_v12 = vld [vmem:[%s1655_s14 + $0x28] sm:$0xff] }
  0xb7   :  { %1083 = vmatmul.mubr.msk.f32.vlgmr.msra.gmra.mxu0 %vm66_vm1, %v206_v13  ;;  %v553_v13 = vld [vmem:[%s1654_s10] sm:$0xff] }
  0xb8   :  { %1093 = vmatpush3.msra.mxu0 %v292_v14  ;;  %1094 = vmatprep.mubr.msk.f32.mxu0 %vm1222_vm3, %v1221_v40  ;;  %v745_v14 = vld [vmem:[%s1655_s14 + $0x20] sm:$0xff] }
  0xb9   :  { %1108 = vmatprep.subr.mxu0 %v1221_v40 }
  0xbb   :  { %1095 = vmatmul.mubr.msk.f32.vlgmr.msra.gmra.mxu0 %vm374_vm12, %v291_v15  ;;  %v744_v15 = vld [vmem:[%s1655_s14 + $0x18] sm:$0xff] }
  0xbc   :  { %1140 = vmatprep.mubr.msk.f32.mxu0 %vm1222_vm3, %v1221_v40  ;;  %1109 = vmatpush3.msra.mxu0 %v568_v43 }
  0xbd   :  { %1110 = vmatprep.subr.mxu0 %v1221_v40 }
  0xbe   :  { %1111 = vmatpush3.msra.mxu0 %v567_v44 }
  0xbf   :  { %1112 = vmatprep.subr.mxu0 %v1221_v40 }
  0xc0   :  { %1113 = vmatpush3.msra.mxu0 %v566_v46 }
  0xc1   :  { %1114 = vmatprep.subr.mxu0 %v1221_v40 }
  0xc2   :  { %1115 = vmatpush3.msra.mxu0 %v565_v49 }
  0xc3   :  { %1116 = vmatprep.subr.mxu0 %v1221_v40 }
  0xc4   :  { %1117 = vmatpush3.msra.mxu0 %v564_v50 }
  0xc5   :  { %1118 = vmatprep.subr.mxu0 %v1221_v40 }
  0xc6   :  { %1119 = vmatpush3.msra.mxu0 %v563_v51 }
  0xc7   :  { %1120 = vmatprep.subr.mxu0 %v1221_v40 }
  0xc8   :  { %1121 = vmatpush3.msra.mxu0 %v562_v52 }
  0xc9   :  { %1122 = vmatprep.subr.mxu0 %v1221_v40 }
  0xca   :  { %1123 = vmatpush3.msra.mxu0 %v561_v53 }
  0xcb   :  { %1124 = vmatprep.subr.mxu0 %v1221_v40 }
  0xcc   :  { %1125 = vmatpush3.msra.mxu0 %v560_v63 }
  0xcd   :  { %1126 = vmatprep.subr.mxu0 %v1221_v40 }
  0xce   :  { %1127 = vmatpush3.msra.mxu0 %v559_v1 }
  0xcf   :  { %1128 = vmatprep.subr.mxu0 %v1221_v40 }
  0xd0   :  { %1129 = vmatpush3.msra.mxu0 %v558_v3 }
  0xd1   :  { %1130 = vmatprep.subr.mxu0 %v1221_v40 }
  0xd2   :  { %1131 = vmatpush3.msra.mxu0 %v557_v5 }
  0xd3   :  { %v370_v18 = vpop.f32.mrf.mxu1  ;;  %1132 = vmatprep.subr.mxu0 %v1221_v40 }
  0xd4   :  { %1133 = vmatpush3.msra.mxu0 %v556_v7 }
  0xd5   :  { %v1091_v19 = vpop.f32.mrf.mxu1  ;;  %1134 = vmatprep.subr.mxu0 %v1221_v40 }
  0xd6   :  { %1135 = vmatpush3.msra.mxu0 %v555_v9 }
  0xd7   :  { %1136 = vmatprep.subr.mxu0 %v1221_v40 }
  0xd8   :  { %1137 = vmatpush3.msra.mxu0 %v554_v11 }
  0xd9   :  { %1138 = vmatprep.subr.mxu0 %v1221_v40 }
  0xda   :  { %1139 = vmatpush3.msra.mxu0 %v553_v13 }
  0xdb   :  { %1185 = vmatprep.subr.mxu0 %v1221_v40 }
 0x177   :  { %v287_v21 = vpop.f32.mrf.mxu0 }
 0x178   :  { %v1424_v22 = vadd.f32 %v1005_v20, %v287_v21 }
 0x179   :  { %v1084_v24 = vpop.f32.mrf.mxu0 }
 0x17a   :  { %1106 = vmatmul.mubr.msk.f32.vlgmr.msra.gmra.mxu1 %vm468_vm13, %v1424_v22 }
 0x17b   :  { %v444_v26 = vpop.f32.mrf.mxu0  ;;  %1144 = vmatpush3.msra.mxu1 %v649_v23  ;;  %1147 = vmatprep.mubr.msk.f32.mxu1 %vm1222_vm3, %v1221_v40 }
 0x17c   :  { %v445_v28 = vadd.f32 %v444_v26, %v370_v18  ;;  %1145 = vmatprep.subr.mxu1 %v1221_v40  ;;  %v741_v18 = vld [vmem:[%s1655_s14] sm:$0xff]  ;;  %v841_v26 = vld [vmem:[%s1656_s17 + $0x8] sm:$0xff] }
 0x17d   :  { %v1096_v29 = vpop.f32.mrf.mxu0  ;;  %1146 = vmatpush3.msra.mxu1 %v648_v25 }
 0x17e   :  { %v1440_v30 = vadd.f32 %v1011_v27, %v445_v28  ;;  %1150 = vmatprep.subr.mxu1 %v1221_v40  ;;  %v840_v27 = vld [vmem:[%s1656_s17] sm:$0xff] }
 0x180   :  { %v456_v31 = vmax.f32 %v1440_v30, 0.0  ;;  %v837_v30 = vld [vmem:[%s1658_s16 + $0x8] sm:$0xff] }
 0x182   :  { %1148 = vmatmul.mubr.msk.f32.vlgmr.msra.gmra.mxu1 %vm657_vm14, %v456_v31 }
 0x183   :  { %1182 = vmatprep.mubr.msk.f32.mxu1 %vm1222_vm3, %v1221_v40  ;;  %1151 = vmatpush3.msra.mxu1 %v756_v45  ;;  %v1020_v45 = vld [vmem:[%s1660_s18] ss:$0 sm:$0xff] }
 0x184   :  { %1152 = vmatprep.subr.mxu1 %v1221_v40 }
 0x185   :  { %1153 = vmatpush3.msra.mxu1 %v755_v47 }
 0x186   :  { %1154 = vmatprep.subr.mxu1 %v1221_v40 }
 0x187   :  { %1155 = vmatpush3.msra.mxu1 %v754_v48 }
 0x188   :  { %1156 = vmatprep.subr.mxu1 %v1221_v40 }
 0x189   :  { %1157 = vmatpush3.msra.mxu1 %v753_v62 }
 0x18a   :  { %1158 = vmatprep.subr.mxu1 %v1221_v40 }
 0x18b   :  { %1159 = vmatpush3.msra.mxu1 %v752_v0 }
 0x18c   :  { %1160 = vmatprep.subr.mxu1 %v1221_v40 }
 0x18d   :  { %1161 = vmatpush3.msra.mxu1 %v751_v2 }
 0x18e   :  { %1162 = vmatprep.subr.mxu1 %v1221_v40 }
 0x18f   :  { %1163 = vmatpush3.msra.mxu1 %v750_v4 }
 0x190   :  { %1164 = vmatprep.subr.mxu1 %v1221_v40 }
 0x191   :  { %1165 = vmatpush3.msra.mxu1 %v749_v6 }
 0x192   :  { %1166 = vmatprep.subr.mxu1 %v1221_v40 }
 0x193   :  { %1167 = vmatpush3.msra.mxu1 %v748_v8 }
 0x194   :  { %1168 = vmatprep.subr.mxu1 %v1221_v40 }
 0x195   :  { %1169 = vmatpush3.msra.mxu1 %v747_v10 }
 0x196   :  { %1170 = vmatprep.subr.mxu1 %v1221_v40 }
 0x197   :  { %1171 = vmatpush3.msra.mxu1 %v746_v12 }
 0x198   :  { %1172 = vmatprep.subr.mxu1 %v1221_v40 }
 0x199   :  { %1173 = vmatpush3.msra.mxu1 %v745_v14 }
 0x19a   :  { %1174 = vmatprep.subr.mxu1 %v1221_v40 }
 0x19b   :  { %1175 = vmatpush3.msra.mxu1 %v744_v15 }
 0x19c   :  { %1176 = vmatprep.subr.mxu1 %v1221_v40 }
 0x19d   :  { %1177 = vmatpush3.msra.mxu1 %v743_v16 }
 0x19e   :  { %1178 = vmatprep.subr.mxu1 %v1221_v40 }
 0x19f   :  { %1179 = vmatpush3.msra.mxu1 %v742_v17 }
 0x1a0   :  { %1180 = vmatprep.subr.mxu1 %v1221_v40 }
 0x1a1   :  { %1181 = vmatpush3.msra.mxu1 %v741_v18 }
 0x23a   :  { %v538_v33 = vpop.f32.mrf.mxu1 }
 0x23b   :  { %v539_v34 = vadd.f32 %v1012_v32, %v538_v33  ;;  %v1017_v33 = vld [vmem:[%s1657_s15] ss:$0 sm:$0xff] }
 0x23c   :  { %v1107_v35 = vpop.f32.mrf.mxu1 }
 0x23d   :  { %1021 = vst [vmem:[%s1652_s19 + $0x8] sm:$0xff] %v539_v34  ;;  %v543_v36 = vsel %vm542_vm15, %v539_v34, -1e+30 }
 0x23e   :  { %544 = vmax.xlane.f32.xlu1 %v543_v36 }
 0x242   :  { %v727_v38 = vpop.f32.mrf.mxu1 }
 0x243   :  { %v728_v39 = vadd.f32 %v1015_v37, %v727_v38  ;;  %v839_v37 = vld [vmem:[%s1658_s16 + $0x18] sm:$0xff]  ;;  %v838_v38 = vld [vmem:[%s1658_s16 + $0x10] sm:$0xff] }
 0x244   :  { %v1149_v41 = vpop.f32.mrf.mxu1 }
 0x245   :  { %1022 = vst [vmem:[%s1652_s19 + $0x10] sm:$0xff] %v728_v39  ;;  %v731_v42 = vsel %vm542_vm15, %v728_v39, -1e+30  ;;  %v836_v41 = vld [vmem:[%s1658_s16] sm:$0xff] }
 0x246   :  { %732 = vmax.xlane.f32.xlu0 %v731_v42 }
 0x2c7   :  { %v545_v54 = vpop.xlane.xlu1 %544 }
 0x2c8   :  { %v546_v55 = vsub.f32 %v543_v36, %v545_v54 }
 0x2ca   :  { %v547_v56 = vmul.f32 1.442695, %v546_v55 }
 0x2cc   :  { %1213 = vpow2.f32 %v547_v56 }
 0x2cf   :  { %v733_v57 = vpop.xlane.xlu0 %732 }
 0x2d0   :  { %v734_v58 = vsub.f32 %v731_v42, %v733_v57 }
 0x2d2   :  { %v735_v59 = vmul.f32 1.442695, %v734_v58 }
 0x2d4   :  { %1215 = vpow2.f32 %v735_v59 }
 0x2d9   :  { %v1506_v60 = vpop.eup %1213 }
 0x2da   :  { %549 = vadd.xlane.f32.xlu1 %v1506_v60 }
 0x2e1   :  { %v1509_v61 = vpop.eup %1215 }
 0x2e2   :  { %737 = vadd.xlane.f32.xlu0 %v1509_v61 }
 0x363   :  { %v550_v19 = vpop.xlane.xlu1 %549 }
 0x364   :  { %1217 = vrcp.f32 %v550_v19 }
 0x36b   :  { %v738_v20 = vpop.xlane.xlu0 %737 }
 0x36c   :  { %1219 = vrcp.f32 %v738_v20 }
 0x371   :  { %v1218_v21 = vpop.eup %1217 }
 0x372   :  { %v552_v23 = vmul.f32 %v1218_v21, %v1506_v60 }
 0x374   :  { %1141 = vmatmul.mubr.f32.vlgmr.msra.gmra.mxu0 %v552_v23 }
 0x375   :  { %1189 = vmatprep.mubr.msk.f32.mxu0 %vm1222_vm3, %v1221_v40  ;;  %1186 = vmatpush3.msra.mxu0 %v841_v26 }
 0x376   :  { %1187 = vmatprep.subr.mxu0 %v1221_v40 }
 0x377   :  { %1188 = vmatpush3.msra.mxu0 %v840_v27 }
 0x378   :  { %1192 = vmatprep.subr.mxu0 %v1221_v40 }
 0x379   :  { %v1220_v24 = vpop.eup %1219 }
 0x37a   :  { %v740_v25 = vmul.f32 %v1220_v24, %v1509_v61 }
 0x37c   :  { %1183 = vmatmul.mubr.f32.vlgmr.msra.gmra.mxu1 %v740_v25 }
 0x434   :  { %v635_v28 = vpop.f32.mrf.mxu0 }
 0x435   :  { %v639_v39 = vadd.f32 %v635_v28, %v1424_v22 }
 0x436   :  { %v1142_v29 = vpop.f32.mrf.mxu0 }
 0x43c   :  { %v823_v32 = vpop.f32.mrf.mxu1 }
 0x43d   :  { %v827_v34 = vadd.f32 %v823_v32, %v456_v31  ;;  %v1014_v31 = vld [vmem:[%s1659_s11] ss:$0 sm:$0xff] }
 0x43e   :  { %v1184_v35 = vpop.f32.mrf.mxu1  ;;  %v647_v42 = vadd.f32 %v1014_v31, %v639_v39 }
 0x43f   :  { %v835_v36 = vadd.f32 %v1017_v33, %v827_v34 }
 0x441   :  { %1190 = vmatmul.mubr.msk.f32.vlgmr.msra.gmra.mxu0 %vm657_vm14, %v835_v36 }
 0x442   :  { %1193 = vmatpush3.msra.mxu0 %v839_v37  ;;  %1200 = vmatprep.mubr.msk.f32.mxu0 %vm1222_vm3, %v1221_v40 }
 0x443   :  { %1194 = vmatprep.subr.mxu0 %v1221_v40 }
 0x444   :  { %1195 = vmatpush3.msra.mxu0 %v838_v38 }
 0x445   :  { %1196 = vmatprep.subr.mxu0 %v1221_v40 }
 0x446   :  { %1197 = vmatpush3.msra.mxu0 %v837_v30 }
 0x447   :  { %1198 = vmatprep.subr.mxu0 %v1221_v40 }
 0x448   :  { %1199 = vmatpush3.msra.mxu0 %v836_v41 }
 0x449   :  { %1201 = vmatmul.mubr.msk.f32.vlgmr.msra.gmra.mxu0 %vm468_vm13, %v647_v42 }
 0x501   :  { %v911_v22 = vpop.f32.mrf.mxu0 }
 0x503   :  { %v1191_v43 = vpop.f32.mrf.mxu0 }
 0x509   :  { %v984_v44 = vpop.f32.mrf.mxu0 }
 0x50a   :  { %v985_v46 = vadd.f32 %v984_v44, %v911_v22 }
 0x50b   :  { %v1202_v47 = vpop.f32.mrf.mxu0 }
 0x50c   :  { %v995_v48 = vadd.f32 %v1020_v45, %v985_v46 }
 0x50e   :  { %996 = vst [vmem:[%s1652_s19] sm:$0xff] %v995_v48 }

</bundles_post_ra>
